<compile_context>
chip_gen: v7x
topology: tpu7x:2x2x1
jax: 0.10.0
libtpu: 0.0.40
codegen_flags: <defaults>
</compile_context>

<pallas_src>
import jax
import jax.numpy as jnp
from jax.experimental import pallas as pl
from jax.experimental.pallas import tpu as pltpu


_LANE = 128


def _round_up(x, m):
    return ((x + m - 1) // m) * m


def _make_outconv_kernel(cin, cout):
    def kernel(w_ref, b_ref, x_ref, o_ref):
        # w_ref: SMEM (cout, cin) f32     b_ref: SMEM (cout,) f32
        # x_ref: VMEM (1, cin, TR, 128)   o_ref: VMEM (1, cout, TR, 128)
        # Unrolled VPU MACs: each output channel is a lane-dense (TR, 128)
        # slab; weights/bias are scalar broadcasts from SMEM.
        for co in range(cout):
            acc = x_ref[0, 0].astype(jnp.float32) * w_ref[co, 0] + b_ref[co]
            for ci in range(1, cin):
                acc = acc + x_ref[0, ci].astype(jnp.float32) * w_ref[co, ci]
            o_ref[0, co] = acc.astype(o_ref.dtype)

    return kernel


def outconv(x, weight, bias, *, target_rows=512):
    """1x1x1 Conv3d forward.

    x:      (N, Cin, D, H, W)
    weight: (Cout, Cin, 1, 1, 1)
    bias:   (Cout,)
    returns (N, Cout, D, H, W)
    """
    n, cin, d, h, w = x.shape
    cout = weight.shape[0]
    m = d * h * w

    w2d = weight.reshape(cout, cin).astype(jnp.float32)   # (Cout, Cin)
    b1d = bias.reshape(cout).astype(jnp.float32)          # (Cout,)

    # Spatial axis -> (rows, 128): lanes carry spatial, channels stay outer.
    rows = pl.cdiv(m, _LANE)
    tr = min(target_rows, _round_up(rows, 8))   # sublane tile, multiple of 8
    rows_pad = _round_up(rows, tr)
    m_pad = rows_pad * _LANE

    x3 = x.reshape(n, cin, m)                   # free reshape, keeps NCDHW
    if m_pad != m:
        x3 = jnp.pad(x3, ((0, 0), (0, 0), (0, m_pad - m)))
    x4 = x3.reshape(n, cin, rows_pad, _LANE)    # free reshape (contiguous)

    grid = (n, rows_pad // tr)

    out4 = pl.pallas_call(
        _make_outconv_kernel(cin, cout),
        out_shape=jax.ShapeDtypeStruct((n, cout, rows_pad, _LANE), x.dtype),
        grid_spec=pltpu.PrefetchScalarGridSpec(
            num_scalar_prefetch=2,              # weight + bias -> SMEM, resident
            grid=grid,
            in_specs=[
                pl.BlockSpec((1, cin, tr, _LANE),
                             lambda ni, mi, w_s, b_s: (ni, 0, mi, 0)),
            ],
            out_specs=pl.BlockSpec((1, cout, tr, _LANE),
                                   lambda ni, mi, w_s, b_s: (ni, 0, mi, 0)),
        ),
        compiler_params=pltpu.CompilerParams(
            dimension_semantics=("parallel", "parallel")),
    )(w2d, b1d, x4)

    out = out4.reshape(n, cout, m_pad)[:, :, :m]
    return out.reshape(n, cout, d, h, w)


if __name__ == "__main__":
    in_channels, out_channels = 4, 3
    N, D, H, W = 2, 4, 6, 10   # D*H*W = 240 -> exercises the lane-padding path

    key = jax.random.PRNGKey(0)
    kx, kw, kb = jax.random.split(key, 3)

    x = jax.random.normal(kx, (N, in_channels, D, H, W), dtype=jnp.float32)
    # Deterministic synthetic parameters (shapes match nn.Conv3d(in, out, 1)).
    bound = 1.0 / jnp.sqrt(float(in_channels))
    weight = jax.random.uniform(kw, (out_channels, in_channels, 1, 1, 1),
                                minval=-bound, maxval=bound, dtype=jnp.float32)
    bias = jax.random.uniform(kb, (out_channels,),
                              minval=-bound, maxval=bound, dtype=jnp.float32)

    out = outconv(x, weight, bias)
    out = jax.block_until_ready(out)

    # Reference check in plain JAX.
    ref = jnp.einsum("ncdhw,oc->nodhw", x,
                     weight.reshape(out_channels, in_channels))
    ref = ref + bias.reshape(1, out_channels, 1, 1, 1)

    assert out.shape == (N, out_channels, D, H, W)
    assert jnp.allclose(out, ref, atol=1e-5, rtol=1e-5)

    print("KERNEL_OK")
</pallas_src>

<mosaic_0001>
module attributes {stable_mosaic.version = 11 : i64} {
  func.func @kernel(%arg0: i32, %arg1: i32, %arg2: memref<3x4xf32, #tpu.memory_space<smem>>, %arg3: memref<3xf32, #tpu.memory_space<smem>>, %arg4: memref<1x4x8x128xf32, #tpu.memory_space<vmem>>, %arg5: memref<1x3x8x128xf32, #tpu.memory_space<vmem>>) attributes {dimension_semantics = [#tpu.dimension_semantics<parallel>, #tpu.dimension_semantics<parallel>], iteration_bounds = array<i64: 2, 1>, scalar_prefetch = 2 : i64, scratch_operands = 0 : i64, tpu.core_type = #tpu.core_type<tc>, window_params = [{transform_indices = @transform_0, window_bounds = array<i64: 1, 4, 8, 128>}, {transform_indices = @transform_1, window_bounds = array<i64: 1, 3, 8, 128>}]} {
    %c0 = arith.constant 0 : index
    %c0_0 = arith.constant 0 : index
    %c0_1 = arith.constant 0 : index
    %c0_2 = arith.constant 0 : index
    %0 = vector.load %arg4[%c0, %c0_0, %c0_1, %c0_2] : memref<1x4x8x128xf32, #tpu.memory_space<vmem>>, vector<1x1x8x128xf32>
    %1 = vector.shape_cast %0 : vector<1x1x8x128xf32> to vector<8x128xf32>
    %c0_3 = arith.constant 0 : index
    %c0_4 = arith.constant 0 : index
    %2 = memref.load %arg2[%c0_3, %c0_4] : memref<3x4xf32, #tpu.memory_space<smem>>
    %3 = vector.broadcast %2 : f32 to vector<8x128xf32>
    %4 = arith.mulf %1, %3 : vector<8x128xf32>
    %c0_5 = arith.constant 0 : index
    %5 = memref.load %arg3[%c0_5] : memref<3xf32, #tpu.memory_space<smem>>
    %6 = vector.broadcast %5 : f32 to vector<8x128xf32>
    %7 = arith.addf %4, %6 : vector<8x128xf32>
    %c0_6 = arith.constant 0 : index
    %c1 = arith.constant 1 : index
    %c0_7 = arith.constant 0 : index
    %c0_8 = arith.constant 0 : index
    %8 = vector.load %arg4[%c0_6, %c1, %c0_7, %c0_8] : memref<1x4x8x128xf32, #tpu.memory_space<vmem>>, vector<1x1x8x128xf32>
    %9 = vector.shape_cast %8 : vector<1x1x8x128xf32> to vector<8x128xf32>
    %c0_9 = arith.constant 0 : index
    %c1_10 = arith.constant 1 : index
    %10 = memref.load %arg2[%c0_9, %c1_10] : memref<3x4xf32, #tpu.memory_space<smem>>
    %11 = vector.broadcast %10 : f32 to vector<8x128xf32>
    %12 = arith.mulf %9, %11 : vector<8x128xf32>
    %13 = arith.addf %7, %12 : vector<8x128xf32>
    %c0_11 = arith.constant 0 : index
    %c2 = arith.constant 2 : index
    %c0_12 = arith.constant 0 : index
    %c0_13 = arith.constant 0 : index
    %14 = vector.load %arg4[%c0_11, %c2, %c0_12, %c0_13] : memref<1x4x8x128xf32, #tpu.memory_space<vmem>>, vector<1x1x8x128xf32>
    %15 = vector.shape_cast %14 : vector<1x1x8x128xf32> to vector<8x128xf32>
    %c0_14 = arith.constant 0 : index
    %c2_15 = arith.constant 2 : index
    %16 = memref.load %arg2[%c0_14, %c2_15] : memref<3x4xf32, #tpu.memory_space<smem>>
    %17 = vector.broadcast %16 : f32 to vector<8x128xf32>
    %18 = arith.mulf %15, %17 : vector<8x128xf32>
    %19 = arith.addf %13, %18 : vector<8x128xf32>
    %c0_16 = arith.constant 0 : index
    %c3 = arith.constant 3 : index
    %c0_17 = arith.constant 0 : index
    %c0_18 = arith.constant 0 : index
    %20 = vector.load %arg4[%c0_16, %c3, %c0_17, %c0_18] : memref<1x4x8x128xf32, #tpu.memory_space<vmem>>, vector<1x1x8x128xf32>
    %21 = vector.shape_cast %20 : vector<1x1x8x128xf32> to vector<8x128xf32>
    %c0_19 = arith.constant 0 : index
    %c3_20 = arith.constant 3 : index
    %22 = memref.load %arg2[%c0_19, %c3_20] : memref<3x4xf32, #tpu.memory_space<smem>>
    %23 = vector.broadcast %22 : f32 to vector<8x128xf32>
    %24 = arith.mulf %21, %23 : vector<8x128xf32>
    %25 = arith.addf %19, %24 : vector<8x128xf32>
    %c0_21 = arith.constant 0 : index
    %c0_22 = arith.constant 0 : index
    %c0_23 = arith.constant 0 : index
    %c0_24 = arith.constant 0 : index
    %26 = vector.load %arg5[%c0_21, %c0_22, %c0_23, %c0_24] : memref<1x3x8x128xf32, #tpu.memory_space<vmem>>, vector<1x1x8x128xf32>
    %27 = vector.shape_cast %26 : vector<1x1x8x128xf32> to vector<8x128xf32>
    %28 = vector.shape_cast %25 : vector<8x128xf32> to vector<1x1x8x128xf32>
    tpu.vector_store %arg5[%c0_21, %c0_22, %c0_23, %c0_24], %28 {strides = array<i32>} : memref<1x3x8x128xf32, #tpu.memory_space<vmem>>, vector<1x1x8x128xf32>,
    %c0_25 = arith.constant 0 : index
    %c0_26 = arith.constant 0 : index
    %c0_27 = arith.constant 0 : index
    %c0_28 = arith.constant 0 : index
    %29 = vector.load %arg4[%c0_25, %c0_26, %c0_27, %c0_28] : memref<1x4x8x128xf32, #tpu.memory_space<vmem>>, vector<1x1x8x128xf32>
    %30 = vector.shape_cast %29 : vector<1x1x8x128xf32> to vector<8x128xf32>
    %c1_29 = arith.constant 1 : index
    %c0_30 = arith.constant 0 : index
    %31 = memref.load %arg2[%c1_29, %c0_30] : memref<3x4xf32, #tpu.memory_space<smem>>
    %32 = vector.broadcast %31 : f32 to vector<8x128xf32>
    %33 = arith.mulf %30, %32 : vector<8x128xf32>
    %c1_31 = arith.constant 1 : index
    %34 = memref.load %arg3[%c1_31] : memref<3xf32, #tpu.memory_space<smem>>
    %35 = vector.broadcast %34 : f32 to vector<8x128xf32>
    %36 = arith.addf %33, %35 : vector<8x128xf32>
    %c0_32 = arith.constant 0 : index
    %c1_33 = arith.constant 1 : index
    %c0_34 = arith.constant 0 : index
    %c0_35 = arith.constant 0 : index
    %37 = vector.load %arg4[%c0_32, %c1_33, %c0_34, %c0_35] : memref<1x4x8x128xf32, #tpu.memory_space<vmem>>, vector<1x1x8x128xf32>
    %38 = vector.shape_cast %37 : vector<1x1x8x128xf32> to vector<8x128xf32>
    %c1_36 = arith.constant 1 : index
    %c1_37 = arith.constant 1 : index
    %39 = memref.load %arg2[%c1_36, %c1_37] : memref<3x4xf32, #tpu.memory_space<smem>>
    %40 = vector.broadcast %39 : f32 to vector<8x128xf32>
    %41 = arith.mulf %38, %40 : vector<8x128xf32>
    %42 = arith.addf %36, %41 : vector<8x128xf32>
    %c0_38 = arith.constant 0 : index
    %c2_39 = arith.constant 2 : index
    %c0_40 = arith.constant 0 : index
    %c0_41 = arith.constant 0 : index
    %43 = vector.load %arg4[%c0_38, %c2_39, %c0_40, %c0_41] : memref<1x4x8x128xf32, #tpu.memory_space<vmem>>, vector<1x1x8x128xf32>
    %44 = vector.shape_cast %43 : vector<1x1x8x128xf32> to vector<8x128xf32>
    %c1_42 = arith.constant 1 : index
    %c2_43 = arith.constant 2 : index
    %45 = memref.load %arg2[%c1_42, %c2_43] : memref<3x4xf32, #tpu.memory_space<smem>>
    %46 = vector.broadcast %45 : f32 to vector<8x128xf32>
    %47 = arith.mulf %44, %46 : vector<8x128xf32>
    %48 = arith.addf %42, %47 : vector<8x128xf32>
    %c0_44 = arith.constant 0 : index
    %c3_45 = arith.constant 3 : index
    %c0_46 = arith.constant 0 : index
    %c0_47 = arith.constant 0 : index
    %49 = vector.load %arg4[%c0_44, %c3_45, %c0_46, %c0_47] : memref<1x4x8x128xf32, #tpu.memory_space<vmem>>, vector<1x1x8x128xf32>
    %50 = vector.shape_cast %49 : vector<1x1x8x128xf32> to vector<8x128xf32>
    %c1_48 = arith.constant 1 : index
    %c3_49 = arith.constant 3 : index
    %51 = memref.load %arg2[%c1_48, %c3_49] : memref<3x4xf32, #tpu.memory_space<smem>>
    %52 = vector.broadcast %51 : f32 to vector<8x128xf32>
    %53 = arith.mulf %50, %52 : vector<8x128xf32>
    %54 = arith.addf %48, %53 : vector<8x128xf32>
    %c0_50 = arith.constant 0 : index
    %c1_51 = arith.constant 1 : index
    %c0_52 = arith.constant 0 : index
    %c0_53 = arith.constant 0 : index
    %55 = vector.load %arg5[%c0_50, %c1_51, %c0_52, %c0_53] : memref<1x3x8x128xf32, #tpu.memory_space<vmem>>, vector<1x1x8x128xf32>
    %56 = vector.shape_cast %55 : vector<1x1x8x128xf32> to vector<8x128xf32>
    %57 = vector.shape_cast %54 : vector<8x128xf32> to vector<1x1x8x128xf32>
    tpu.vector_store %arg5[%c0_50, %c1_51, %c0_52, %c0_53], %57 {strides = array<i32>} : memref<1x3x8x128xf32, #tpu.memory_space<vmem>>, vector<1x1x8x128xf32>,
    %c0_54 = arith.constant 0 : index
    %c0_55 = arith.constant 0 : index
    %c0_56 = arith.constant 0 : index
    %c0_57 = arith.constant 0 : index
    %58 = vector.load %arg4[%c0_54, %c0_55, %c0_56, %c0_57] : memref<1x4x8x128xf32, #tpu.memory_space<vmem>>, vector<1x1x8x128xf32>
    %59 = vector.shape_cast %58 : vector<1x1x8x128xf32> to vector<8x128xf32>
    %c2_58 = arith.constant 2 : index
    %c0_59 = arith.constant 0 : index
    %60 = memref.load %arg2[%c2_58, %c0_59] : memref<3x4xf32, #tpu.memory_space<smem>>
    %61 = vector.broadcast %60 : f32 to vector<8x128xf32>
    %62 = arith.mulf %59, %61 : vector<8x128xf32>
    %c2_60 = arith.constant 2 : index
    %63 = memref.load %arg3[%c2_60] : memref<3xf32, #tpu.memory_space<smem>>
    %64 = vector.broadcast %63 : f32 to vector<8x128xf32>
    %65 = arith.addf %62, %64 : vector<8x128xf32>
    %c0_61 = arith.constant 0 : index
    %c1_62 = arith.constant 1 : index
    %c0_63 = arith.constant 0 : index
    %c0_64 = arith.constant 0 : index
    %66 = vector.load %arg4[%c0_61, %c1_62, %c0_63, %c0_64] : memref<1x4x8x128xf32, #tpu.memory_space<vmem>>, vector<1x1x8x128xf32>
    %67 = vector.shape_cast %66 : vector<1x1x8x128xf32> to vector<8x128xf32>
    %c2_65 = arith.constant 2 : index
    %c1_66 = arith.constant 1 : index
    %68 = memref.load %arg2[%c2_65, %c1_66] : memref<3x4xf32, #tpu.memory_space<smem>>
    %69 = vector.broadcast %68 : f32 to vector<8x128xf32>
    %70 = arith.mulf %67, %69 : vector<8x128xf32>
    %71 = arith.addf %65, %70 : vector<8x128xf32>
    %c0_67 = arith.constant 0 : index
    %c2_68 = arith.constant 2 : index
    %c0_69 = arith.constant 0 : index
    %c0_70 = arith.constant 0 : index
    %72 = vector.load %arg4[%c0_67, %c2_68, %c0_69, %c0_70] : memref<1x4x8x128xf32, #tpu.memory_space<vmem>>, vector<1x1x8x128xf32>
    %73 = vector.shape_cast %72 : vector<1x1x8x128xf32> to vector<8x128xf32>
    %c2_71 = arith.constant 2 : index
    %c2_72 = arith.constant 2 : index
    %74 = memref.load %arg2[%c2_71, %c2_72] : memref<3x4xf32, #tpu.memory_space<smem>>
    %75 = vector.broadcast %74 : f32 to vector<8x128xf32>
    %76 = arith.mulf %73, %75 : vector<8x128xf32>
    %77 = arith.addf %71, %76 : vector<8x128xf32>
    %c0_73 = arith.constant 0 : index
    %c3_74 = arith.constant 3 : index
    %c0_75 = arith.constant 0 : index
    %c0_76 = arith.constant 0 : index
    %78 = vector.load %arg4[%c0_73, %c3_74, %c0_75, %c0_76] : memref<1x4x8x128xf32, #tpu.memory_space<vmem>>, vector<1x1x8x128xf32>
    %79 = vector.shape_cast %78 : vector<1x1x8x128xf32> to vector<8x128xf32>
    %c2_77 = arith.constant 2 : index
    %c3_78 = arith.constant 3 : index
    %80 = memref.load %arg2[%c2_77, %c3_78] : memref<3x4xf32, #tpu.memory_space<smem>>
    %81 = vector.broadcast %80 : f32 to vector<8x128xf32>
    %82 = arith.mulf %79, %81 : vector<8x128xf32>
    %83 = arith.addf %77, %82 : vector<8x128xf32>
    %c0_79 = arith.constant 0 : index
    %c2_80 = arith.constant 2 : index
    %c0_81 = arith.constant 0 : index
    %c0_82 = arith.constant 0 : index
    %84 = vector.load %arg5[%c0_79, %c2_80, %c0_81, %c0_82] : memref<1x3x8x128xf32, #tpu.memory_space<vmem>>, vector<1x1x8x128xf32>
    %85 = vector.shape_cast %84 : vector<1x1x8x128xf32> to vector<8x128xf32>
    %86 = vector.shape_cast %83 : vector<8x128xf32> to vector<1x1x8x128xf32>
    tpu.vector_store %arg5[%c0_79, %c2_80, %c0_81, %c0_82], %86 {strides = array<i32>} : memref<1x3x8x128xf32, #tpu.memory_space<vmem>>, vector<1x1x8x128xf32>,
    return
  }
  func.func @transform_0(%arg0: i32, %arg1: i32, %arg2: memref<3x4xf32, #tpu.memory_space<smem>>, %arg3: memref<3xf32, #tpu.memory_space<smem>>) -> (i32, i32, i32, i32) {
    %c0_i32 = arith.constant 0 : i32
    %c0_i32_0 = arith.constant 0 : i32
    %c0_i32_1 = arith.constant 0 : i32
    return %arg0, %c0_i32, %arg1, %c0_i32_0 : i32, i32, i32, i32
  }
  func.func @transform_1(%arg0: i32, %arg1: i32, %arg2: memref<3x4xf32, #tpu.memory_space<smem>>, %arg3: memref<3xf32, #tpu.memory_space<smem>>) -> (i32, i32, i32, i32) {
    %c0_i32 = arith.constant 0 : i32
    %c0_i32_0 = arith.constant 0 : i32
    %c0_i32_1 = arith.constant 0 : i32
    return %arg0, %c0_i32, %arg1, %c0_i32_0 : i32, i32, i32, i32
  }
}

</mosaic_0001>

<bundles_post_ra>
// kernel: tpu_custom_call.1
= control target key start
LH: loop header
LB: loop body
LE: loop exit
PB: predicated region body
PF: predicated region fallthrough
CT: control target
= control target key end

     0   :  { %s812_s0 = inlined_call_operand.hbm [shape: f32[3,4], index: 0, kind: input, shape index: {}]   ;;  %s813_s2 = inlined_call_operand.hbm [shape: f32[2,4,8,128], index: 2, kind: input, shape index: {}]   ;;  %s814_s3 = inlined_call_operand.hbm [shape: f32[2,3,8,128], index: 3, kind: output, shape index: {}]   ;;  %s815_s1 = inlined_call_operand.vmem [shape: f32[3], index: 1, kind: input, shape index: {}]  }
   0x1   :  { %s443_s14 = scalar_lea.hbm %s812_s0, 64 }
   0x2   :  { %p444_p0 = scmp.ne.s32.totalorder %s812_s0, %s443_s14  ;;  %p447_p1 = scmp.lt.u32.totalorder %s443_s14, %s812_s0 }
   0x4   :  { %p449_p2 = pnand %p447_p1, %p444_p0 }
   0x6   :  { %452 = shalt.err (!%p449_p2)  }
   0x7   :  { %s581_s19 = smov [#allocation3]   ;;  %s10_s24 = sshll.u32 %s815_s1, 4  ;;  %s11_s24 = int_to_ptr.vmem [resolvable:$true] %s10_s24 }
   0x8   :  { %9 = dma.hbm_to_smem %s812_s0, 64, %s581_s19, [#allocation2] }
   0x9   :  { %s453_s25 = scalar_lea.vmem %s11_s24, 16  ;;  %p458_p4 = scmp.lt.s32.totalorder %s11_s24, %s11_s24 }
   0xa   :  { %p454_p3 = scmp.ne.s32.totalorder %s11_s24, %s453_s25  ;;  %p459_p5 = scmp.lt.s32.totalorder %s453_s25, %s453_s25 }
   0xc   :  { %p460_p6 = por %p459_p5, %p458_p4 }
   0xe   :  { %p461_p7 = pnand %p460_p6, %p454_p3 }
  0x10   :  { %464 = shalt.err (!%p461_p7)  }
  0x11   :  { %s582_s26 = smov [#allocation4]  }
  0x12   :  { %13 = dma.vmem_to_smem %s11_s24, 16, %s582_s26, [#allocation2] }
  0x13   :  { %547 = dma.done.wait [#allocation2], 80 }
  0x14   :  { %548 = vsyncadd [#allocation2], 4294967216 }
  0x15   :  { %15 = sfence }
  0x16   :  { %16 = vsyncpa [#allocation6], 0 }
  0x17   :  { %18 = vsyncpa [#allocation6 + $0x1], 0 }
  0x18   :  { %19 = vsyncpa [#allocation7], 0 }
  0x19   :  { %21 = vsyncpa [#allocation7 + $0x1], 0  ;;  %s624_s0 = smov 0   ;;  %s626_s1 = smov 0  }
  0x1a   :  { %s628_s27 = smov 0   ;;  %s630_s28 = smov 0  }
  0x1b   :  { %s632_s29 = smov 0   ;;  %s634_s30 = smov 0  }
  0x1c LB: > { %s336_s4 = sadd.s32 4294967295, %s579_s30   ;;  %s337_s5 = sadd.s32 4294967294, %s579_s30   ;;  %s579_s30 = sphi %s634_s30, %s27_s30   ;;  %s575_s29 = sphi %s632_s29, %s830_s29   ;;  %s571_s28 = sphi %s630_s28, %s829_s28   ;;  %s567_s27 = sphi %s628_s27, %s828_s27   ;;  %s563_s1 = sphi %s626_s1, %s827_s1   ;;  %s559_s0 = sphi %s624_s0, %s826_s0  }
  0x1d   : > { %s39_s6 = sadd.s32 1, %s575_s29  ;;  %s48_s7 = sadd.s32 1, %s567_s27 }
  0x1e   : > { %p41_p8 = scmp.ge.s32.totalorder %s39_s6, 2  ;;  %p55_p9 = scmp.ne.s32.totalorder %s567_s27, %s563_s1 }
  0x1f   : > { %p56_p10 = scmp.eq.s32.totalorder %s579_s30, 0  ;;  %p61_p11 = scmp.ne.s32.totalorder %s563_s1, %s559_s0 }
  0x20   : > { %s832_s6 = smov (%p41_p8, %s39_s6), 0  ;;  %p62_p13 = scmp.eq.s32.totalorder %s336_s4, 0 }
  0x21   : > { %p665_p12 = por %p56_p10, %p55_p9  ;;  %s43_s9 = ssub.s32 %s575_s29, %s832_s6 }
  0x22   : > { %p87_p0 = scmp.eq.s32.totalorder %s336_s4, 1  ;;  %p46_p1 = scmp.eq.s32.totalorder %s43_s9, 0 }
  0x23   : > { %p671_p2 = por %p62_p13, %p61_p11  ;;  %p93_p4 = scmp.eq.s32.totalorder %s337_s5, 1 }
  0x24   : > { %p675_p3 = por %p87_p0, %p55_p9  ;;  %p387_p7 = scmp.lt.s32.totalorder %s579_s30, 2 }
  0x25   : > { %s680_s12 = scalar_select %p46_p1, %s567_s27, %s48_s7  }
  0x26   : > { %s819_s11 = scalar_select %p675_p3, 1, 0 }
  0x27   : > { %p682_p5 = por %p93_p4, %p61_p11  ;;  %s113_s14 = sand.u32 1, %s567_s27  }
  0x28   : > { %s340_s15 = sshll.u32 %s113_s14, 5  ;;  %s372_s16 = sshll.u32 %s575_s29, 9 }
  0x29   : > { %s820_s13 = scalar_select %p682_p5, 1, 0 }
  0x2a   : > { %s693_s19 = scalar_lea.hbm %s813_s2, %s372_s16  ;;  %s117_s20 = scalar_lea.vmem [#allocation5], %s340_s15 }
  0x2b   : > { %s125_s21 = sshll.u32 %s117_s20, 4  ;;  %p699_p8 = pnand %p387_p7, %p665_p12  ;;  %s695_s21 = int_to_ptr.vmem [resolvable:$true] %s125_s21 }
  0x2c   : > { %s704_s23 = scalar_lea.sflag [#allocation6], %s113_s14  ;;  %s465_s24 = scalar_lea.hbm %s693_s19, 512 }
  0x2d   : > { %p466_p10 = scmp.ne.s32.totalorder %s693_s19, %s465_s24  ;;  %p467_p11 = pneg %p699_p8 }
  0x2e   : > { %s470_s4 = scalar_lea.hbm %s813_s2, 1024  ;;  %p471_p12 = scmp.lt.u32.totalorder %s693_s19, %s813_s2 }
  0x2f   : > { %p468_p13 = pnand %p467_p11, %p466_p10  ;;  %p472_p1 = scmp.lt.u32.totalorder %s470_s4, %s465_s24 }
  0x30   : > { %p474_p7 = scmp.lt.u32.totalorder %s465_s24, %s693_s19 }
  0x31   : > { %p469_p0 = pneg %p468_p13  ;;  %p473_p4 = por %p472_p1, %p471_p12 }
  0x33   : > { %p475_p6 = por %p474_p7, %p473_p4 }
  0x35   : > { %p476_p9 = pnand %p475_p6, %p469_p0 }
  0x37   : > { %479 = shalt.err (!%p476_p9)
}
  0x38   : > { %s480_s8 = scalar_lea.vmem %s695_s21, 512  ;;  %s583_s9 = smov [#allocation5]  }
  0x39   : > { %p481_p10 = scmp.ne.s32.totalorder %s695_s21, %s480_s8  ;;  %s485_s14 = sshll.u32 %s583_s9, 4  ;;  %s486_s14 = int_to_ptr.vmem [resolvable:$false] %s485_s14 }
  0x3a   : > { %s487_s15 = scalar_lea.vmem %s486_s14, 1024  ;;  %p488_p3 = scmp.lt.s32.totalorder %s695_s21, %s486_s14 }
  0x3b   : > { %p483_p13 = pnand %p481_p10, %p467_p11  ;;  %p489_p12 = scmp.lt.s32.totalorder %s487_s15, %s480_s8 }
  0x3d   : > { %p484_p5 = pneg %p483_p13  ;;  %p490_p1 = por %p489_p12, %p488_p3 }
  0x3f   : > { %p491_p4 = pnand %p490_p1, %p484_p5 }
  0x41   : > { %494 = shalt.err (!%p491_p4)
}
  0x42   : > { %s584_s16 = smov 128   ;;  %s585_s17 = smov 8  }
  0x43   : > { %382 = dma.hbm_to_vmem [thread:$0]  (!%p699_p8), %s693_s19, 512, %s695_s21, %s704_s23, %s584_s16, %s584_s16, %s585_s17  }
  0x44   : > { %p133_p6 = scmp.lt.s32.totalorder %s579_s30, 3  ;;  %p822_p9 = scmp.ge.s32.totalorder %s579_s30, 1 }
  0x46   : > { %p134_p11 = pnand %p822_p9, %p133_p6 }
  0x47   : > { %s736_s18 = sand.u32 (!%p134_p11), 1, %s563_s1  }
  0x48   : > { %137 = sbr.rel (%p134_p11) target bundleno = 118 (0x76), region = 24  ;;  %s344_s20 = sshll.u32 (!%p134_p11), %s736_s18, 5 }
  0x49   : > { %s140_s24 = scalar_lea.sflag (!%p134_p11), [#allocation6], %s736_s18  ;;  %s143_s25 = scalar_lea.vmem (!%p134_p11), [#allocation5], %s344_s20 }
  0x4f   : > { %550 = dma.done.wait (%p671_p2), %s140_s24, 512  }
  0x50   : > { %552 = vsyncadd (%p671_p2), %s140_s24, 4294966784  ;;  %s163_s22 = sld [smem:[#allocation3]]  ;;  %s346_s21 = sld [smem:[#allocation3 + $0x1]]  ;;  %v162_v0 = vld [vmem:[%s143_s25] sm:$0xff]  ;;  %v345_v3 = vld [vmem:[%s143_s25 + $0x8] sm:$0xff] }
  0x51   : > { %s166_s19 = sld [smem:[#allocation4]]  ;;  %s348_s23 = sld [smem:[#allocation3 + $0x2]]  ;;  %v347_v6 = vld [vmem:[%s143_s25 + $0x10] sm:$0xff]  ;;  %v349_v9 = vld [vmem:[%s143_s25 + $0x18] sm:$0xff] }
  0x52   : > { %s350_s26 = sld [smem:[#allocation3 + $0x3]]  ;;  %s351_s4 = sld [smem:[#allocation3 + $0x80]] }
  0x53   : > { %s744_s5 = sld [smem:[#allocation4 + $0x1]]  ;;  %s356_s8 = sld [smem:[#allocation3 + $0x82]] }
  0x54   : > { %s354_s7 = sld [smem:[#allocation3 + $0x81]]  ;;  %s358_s9 = sld [smem:[#allocation3 + $0x83]] }
  0x55   : > { %s746_s14 = sld [smem:[#allocation3 + $0x100]]  ;;  %s748_s10 = sld [smem:[#allocation4 + $0x2]] }
  0x56   : > { %v164_v1 = vstv %s163_s22  ;;  %v172_v5 = vstv %s346_s21  ;;  %s363_s15 = sld [smem:[#allocation3 + $0x101]]  ;;  %s365_s16 = sld [smem:[#allocation3 + $0x102]] }
  0x57   : > { %v167_v2 = vstv %s166_s19  ;;  %v165_v4 = vmul.f32 %v164_v1, %v162_v0  ;;  %v173_v7 = vmul.f32 %v345_v3, %v172_v5  ;;  %v178_v8 = vstv %s348_s23  ;;  %s750_s17 = sld [smem:[#allocation3 + $0x103]]  ;;  %s373_s20 = smul.u32 24, %s736_s18 }
  0x58   : > { %v184_v10 = vstv %s350_s26  ;;  %v179_v12 = vmul.f32 %v347_v6, %v178_v8  ;;  %v190_v13 = vstv %s351_s4  ;;  %s374_s22 = smul.u32 384, %s571_s28  ;;  %s237_s26 = scalar_lea.sflag [#allocation7], %s736_s18 }
  0x59   : > { %v168_v11 = vadd.f32 %v167_v2, %v165_v4  ;;  %v191_v14 = vmul.f32 %v190_v13, %v162_v0  ;;  %v193_v15 = vstv %s744_s5  ;;  %v185_v17 = vmul.f32 %v349_v9, %v184_v10  ;;  %s161_s24 = scalar_lea.vmem [#allocation8], %s373_s20  ;;  %p823_p3 = scmp.ne.s32.totalorder %s819_s11, 0 }
  0x5a   : > { %v197_v18 = vstv %s354_s7  ;;  %v202_v19 = vstv %s356_s8  ;;  %v207_v23 = vstv %s358_s9  ;;  %s251_s25 = sshll.u32 %s161_s24, 4  ;;  %s763_s23 = scalar_lea.hbm %s814_s3, %s374_s22  ;;  %s758_s25 = int_to_ptr.vmem [resolvable:$true] %s251_s25 }
  0x5b   : > { %v174_v16 = vadd.f32 %v173_v7, %v168_v11  ;;  %v194_v20 = vadd.f32 %v193_v15, %v191_v14  ;;  %v198_v21 = vmul.f32 %v345_v3, %v197_v18  ;;  %v203_v22 = vmul.f32 %v347_v6, %v202_v19  ;;  %s495_s4 = scalar_lea.vmem %s758_s25, 384  ;;  %s586_s28 = smov [#allocation8]  }
  0x5c   : > { %v208_v25 = vmul.f32 %v349_v9, %v207_v23  ;;  %v214_v26 = vstv %s746_s14  ;;  %v217_v27 = vstv %s748_s10  ;;  %v221_v30 = vstv %s363_s15  ;;  %p496_p2 = scmp.ne.s32.totalorder %s758_s25, %s495_s4  ;;  %s499_s5 = sshll.u32 %s586_s28, 4  ;;  %s500_s5 = int_to_ptr.vmem [resolvable:$false] %s499_s5 }
  0x5d   : > { %v180_v24 = vadd.f32 %v179_v12, %v174_v16  ;;  %v199_v28 = vadd.f32 %v198_v21, %v194_v20  ;;  %v215_v29 = vmul.f32 %v214_v26, %v162_v0  ;;  %v226_v31 = vstv %s365_s16  ;;  %s501_s7 = scalar_lea.vmem %s500_s5, 768  ;;  %p502_p0 = scmp.lt.s32.totalorder %s758_s25, %s500_s5 }
  0x5e   : > { %v222_v33 = vmul.f32 %v345_v3, %v221_v30  ;;  %v231_v34 = vstv %s750_s17  ;;  %v227_v37 = vmul.f32 %v347_v6, %v226_v31  ;;  %p497_p5 = pnand %p496_p2, %p823_p3  ;;  %p503_p7 = scmp.lt.s32.totalorder %s501_s7, %s495_s4 }
  0x5f   : > { %v186_v32 = vadd.f32 %v185_v17, %v180_v24  ;;  %v204_v35 = vadd.f32 %v203_v22, %v199_v28  ;;  %v218_v36 = vadd.f32 %v217_v27, %v215_v29  ;;  %v232_v40 = vmul.f32 %v349_v9, %v231_v34 }
  0x60   : > { %p498_p8 = pneg %p497_p5  ;;  %p504_p10 = por %p503_p7, %p502_p0 }
  0x61   : > { %187 = vst [vmem:[%s161_s24] sm:$0xff] %v186_v32  ;;  %v209_v38 = vadd.f32 %v208_v25, %v204_v35  ;;  %v223_v39 = vadd.f32 %v222_v33, %v218_v36 }
  0x62   : > { %p505_p13 = pnand %p504_p10, %p498_p8 }
  0x63   : > { %359 = vst [vmem:[%s161_s24 + $0x8] sm:$0xff] %v209_v38  ;;  %v228_v41 = vadd.f32 %v227_v37, %v223_v39 }
  0x65   : > { %v233_v42 = vadd.f32 %v232_v40, %v228_v41 }
  0x67   : > { %368 = vst [vmem:[%s161_s24 + $0x10] sm:$0xff] %v233_v42 }
  0x68   : > { %508 = shalt.err (!%p505_p13)
}
  0x69   : > { %s509_s8 = scalar_lea.hbm %s763_s23, 384  ;;  %s513_s10 = scalar_lea.hbm %s814_s3, 768 }
  0x6a   : > { %p510_p12 = scmp.ne.s32.totalorder %s763_s23, %s509_s8  ;;  %p514_p6 = scmp.lt.u32.totalorder %s763_s23, %s814_s3 }
  0x6b   : > { %p515_p9 = scmp.lt.u32.totalorder %s513_s10, %s509_s8  ;;  %p517_p2 = scmp.lt.u32.totalorder %s509_s8, %s763_s23 }
  0x6c   : > { %p511_p1 = pnand %p510_p12, %p823_p3 }
  0x6d   : > { %p516_p11 = por %p515_p9, %p514_p6 }
  0x6e   : > { %p512_p4 = pneg %p511_p1 }
  0x6f   : > { %p518_p5 = por %p517_p2, %p516_p11 }
  0x71   : > { %p519_p8 = pnand %p518_p5, %p512_p4 }
  0x73   : > { %522 = shalt.err (!%p519_p8)
}
  0x74   : > { %s587_s17 = smov 128   ;;  %s588_s20 = smov 8  }
  0x75   : > { %377 = dma.vmem_to_hbm [thread:$0]  (%p823_p3), %s758_s25, 384, %s763_s23, %s237_s26, %s587_s17, %s587_s17, %s588_s20  }
  0x76 PF: > { %s266_s24 = sand.u32 1, %s559_s0   ;;  %p824_p0 = scmp.ne.s32.totalorder %s820_s13, 0 }
  0x77   : > { %p825_p7 = scmp.ge.s32.totalorder %s579_s30, 2  ;;  %s267_s22 = scalar_lea.sflag [#allocation7], %s266_s24 }
  0x79   : > { %p384_p10 = pnand %p825_p7, %p824_p0 }
  0x7b   : > { %554 = dma.done.wait (!%p384_p10), %s267_s22, 384  }
  0x7c   : > { %556 = vsyncadd (!%p384_p10), %s267_s22, 4294966912  ;;  %s27_s30 = sadd.s32 1, %s579_s30   ;;  %s826_s0 = smov %s563_s1 }
  0x7d   : > { %p24_p13 = scmp.ge.s32.totalorder %s27_s30, 4   ;;  %s827_s1 = smov %s567_s27 }
  0x7e   : > { %s828_s27 = smov %s680_s12  ;;  %s829_s28 = smov %s575_s29 }
  0x7f   : > { %s830_s29 = smov %s832_s6  ;;  %26 = sbr.rel (!%p24_p13) target bundleno = 28 (0x1c), region = 74 }
  0x86   :  { %272 = vsyncpa [#allocation6], 1 }
  0x87   :  { %274 = vsyncpa [#allocation6 + $0x1], 1 }
  0x88   :  { %275 = vsyncpa [#allocation7], 1 }
  0x89   :  { %277 = vsyncpa [#allocation7 + $0x1], 1 }

</bundles_post_ra>
